<compile_context>
chip_gen: v6e
topology: v6e:2x2x1
jax: 0.10.0
libtpu: 0.0.40
codegen_flags: <defaults>
</compile_context>

<pallas_src>
import functools

import jax
import jax.numpy as jnp
import numpy as np
from jax.experimental import pallas as pl
from jax.experimental.pallas import tpu as pltpu


# ---------------------------------------------------------------------------
# 1-D interpolation matrices (numpy -> baked in as compile-time constants).
# ---------------------------------------------------------------------------
def _bilinear_matrix(out_size: int, in_size: int, scale: float) -> np.ndarray:
    """(out_size, in_size) matrix reproducing PyTorch bilinear, align_corners=False.

    Exact for integer scale factors (the DLA34 use case, scale=2).
    """
    o = np.arange(out_size, dtype=np.float64)
    src = (o + 0.5) / float(scale) - 0.5
    src = np.maximum(src, 0.0)                       # PyTorch clamps at 0 only
    lo = np.clip(np.floor(src).astype(np.int64), 0, in_size - 1)
    hi = np.minimum(lo + 1, in_size - 1)
    w_hi = src - lo
    w_lo = 1.0 - w_hi
    a = np.zeros((out_size, in_size), np.float64)
    rows = np.arange(out_size)
    np.add.at(a, (rows, lo), w_lo)
    np.add.at(a, (rows, hi), w_hi)
    return a.astype(np.float32)


def _nearest_matrix(out_size: int, in_size: int, scale: float) -> np.ndarray:
    """(out_size, in_size) matrix reproducing PyTorch legacy 'nearest' (floor rule)."""
    o = np.arange(out_size, dtype=np.float64)
    src = np.clip(np.floor(o * (in_size / float(out_size))).astype(np.int64),
                  0, in_size - 1)
    a = np.zeros((out_size, in_size), np.float32)
    a[np.arange(out_size), src] = 1.0
    return a


# ---------------------------------------------------------------------------
# Batch-size selection against a per-generation-safe VMEM budget.
# ---------------------------------------------------------------------------
def _round_up(v: int, m: int) -> int:
    return ((v + m - 1) // m) * m


def _padded_elems(rows: int, cols: int) -> int:
    # VMEM tiles are (8, 128): account for lane/sublane padding of narrow dims.
    return _round_up(rows, 8) * _round_up(cols, 128)


def _vmem_estimate(b, h, w, h_out, w_out, itemsize):
    xb = 2 * _padded_elems(b * h, w) * itemsize          # x block, double-buffered
    ob = 2 * _padded_elems(b * h_out, w_out) * itemsize  # out block, double-buffered
    sc = 4 * max(_padded_elems(b * h_out, w),            # f32 scratch (either order)
                 _padded_elems(b * h, w_out))
    ab = 2 * 4 * (_padded_elems(h_out, h) + _padded_elems(w, w_out))
    return xb + ob + sc + ab


def _pick_batch_flat(nc, h, w, h_out, w_out, itemsize,
                     budget_bytes=10 * 1024 * 1024, cap=64):
    """Largest divisor B of nc whose blocks fit the budget AND satisfy (8,128).

    Returns None if no aligned configuration exists (use the 3-D fallback).
    """
    best = None
    for b in range(1, nc + 1):
        if b > cap:
            break
        if nc % b:
            continue
        aligned = (b == nc) or ((b * h) % 8 == 0 and (b * h_out) % 8 == 0)
        if not aligned:
            continue
        if _vmem_estimate(b, h, w, h_out, w_out, itemsize) > budget_bytes:
            continue
        best = b
    return best


def _pick_batch_slices(nc, h, w, h_out, w_out, itemsize,
                       budget_bytes=10 * 1024 * 1024, cap=64):
    """Largest divisor B of nc fitting the budget for the 3-D per-slice path."""
    best = 1
    for b in range(1, nc + 1):
        if b > cap:
            break
        if nc % b:
            continue
        xb = 2 * b * _padded_elems(h, w) * itemsize
        ob = 2 * b * _padded_elems(h_out, w_out) * itemsize
        ab = 2 * 4 * (_padded_elems(h_out, h) + _padded_elems(w, w_out))
        if xb + ob + ab > budget_bytes:
            continue
        best = b
    return best


# ---------------------------------------------------------------------------
# Kernels.
# ---------------------------------------------------------------------------
def _make_flat_kernel(b, h, w, h_out, w_out, h_first, cdtype):
    """2-D flat-slab kernel: B slices per grid step, two MXU matmul stages."""

    def kernel(ah_ref, awt_ref, x_ref, o_ref, t_ref):
        ah = ah_ref[...]        # (H_out, H)   cdtype
        awt = awt_ref[...]      # (W,  W_out)  cdtype

        if h_first:
            # Stage 1: per-slice H-axis matmul on the smaller, pre-upsample data.
            for i in range(b):
                xi = x_ref[i * h:(i + 1) * h, :].astype(cdtype)            # (H, W)
                t_ref[i * h_out:(i + 1) * h_out, :] = jnp.dot(
                    ah, xi, preferred_element_type=jnp.float32)            # (H_out, W)
            # Stage 2: one big flat GEMM over W (M = B*H_out) -> single dense store.
            o_ref[...] = jnp.dot(t_ref[...].astype(cdtype), awt,
                                 preferred_element_type=jnp.float32
                                 ).astype(o_ref.dtype)                     # (B*H_out, W_out)
        else:
            # Stage 1: one big flat GEMM over W (M = B*H).
            t_ref[...] = jnp.dot(x_ref[...].astype(cdtype), awt,
                                 preferred_element_type=jnp.float32)       # (B*H, W_out)
            # Stage 2: per-slice H-axis matmul, stored straight into the output.
            for i in range(b):
                ti = t_ref[i * h:(i + 1) * h, :].astype(cdtype)            # (H, W_out)
                o_ref[i * h_out:(i + 1) * h_out, :] = jnp.dot(
                    ah, ti, preferred_element_type=jnp.float32
                ).astype(o_ref.dtype)                                      # (H_out, W_out)

    return kernel


def _make_slice_kernel(b, h_first, cdtype):
    """3-D fallback kernel (always legal w.r.t. the (8,128) block rule)."""

    def kernel(ah_ref, awt_ref, x_ref, o_ref):
        ah = ah_ref[...]
        awt = awt_ref[...]
        for i in range(b):
            xi = x_ref[i].astype(cdtype)                                   # (H, W)
            if h_first:
                t = jnp.dot(ah, xi,
                            preferred_element_type=jnp.float32).astype(cdtype)
                o_ref[i] = jnp.dot(t, awt,
                                   preferred_element_type=jnp.float32
                                   ).astype(o_ref.dtype)
            else:
                t = jnp.dot(xi, awt,
                            preferred_element_type=jnp.float32).astype(cdtype)
                o_ref[i] = jnp.dot(ah, t,
                                   preferred_element_type=jnp.float32
                                   ).astype(o_ref.dtype)

    return kernel


# ---------------------------------------------------------------------------
# Public entry point.
# ---------------------------------------------------------------------------
@functools.partial(jax.jit, static_argnames=("scale", "mode"))
def interpolate(x: jnp.ndarray, scale: float = 2.0, mode: str = "bilinear"):
    """Equivalent of F.interpolate(x, scale_factor=scale, mode=mode, align_corners=False).

    x: (N, C, H, W)  ->  (N, C, H*scale, W*scale)
    """
    n, c, h, w = x.shape
    nc = n * c
    h_out = int(h * float(scale))
    w_out = int(w * float(scale))

    if mode == "bilinear":
        a_h_np = _bilinear_matrix(h_out, h, scale)
        a_w_np = _bilinear_matrix(w_out, w, scale)
    elif mode == "nearest":
        a_h_np = _nearest_matrix(h_out, h, scale)
        a_w_np = _nearest_matrix(w_out, w, scale)
    else:
        # TODO(synk): bicubic / trilinear modes not implemented in this kernel.
        raise NotImplementedError(f"mode={mode!r} not supported")

    # MXU compute dtype: native bf16 path for bf16 inputs (scale=2 weights are
    # exact in bf16), f32 otherwise.  Accumulation is always f32.
    cdtype = jnp.bfloat16 if x.dtype == jnp.bfloat16 else jnp.float32
    a_h = jnp.asarray(a_h_np, dtype=cdtype)                # (H_out, H)
    a_w_t = jnp.asarray(a_w_np.T, dtype=cdtype)            # (W, W_out) -> no in-kernel transpose

    # Static matmul-order choice: minimize total MACs (and intermediate size).
    cost_h_first = h_out * w * (h + w_out)
    cost_w_first = h * w_out * (w + h_out)
    h_first = cost_h_first <= cost_w_first

    itemsize = jnp.dtype(x.dtype).itemsize
    cost_est = pl.CostEstimate(
        flops=2 * nc * min(cost_h_first, cost_w_first),
        transcendentals=0,
        bytes_accessed=(nc * h * w + nc * h_out * w_out) * itemsize
        + (h_out * h + w * w_out) * jnp.dtype(cdtype).itemsize,
    )
    cparams = pltpu.CompilerParams(
        dimension_semantics=("parallel",),                  # shards across v7x's 2 TCs
        vmem_limit_bytes=32 * 1024 * 1024,                  # v5e default (16 MiB) is too small
    )

    b_flat = _pick_batch_flat(nc, h, w, h_out, w_out, itemsize)

    if b_flat is not None:
        # ---- main path: 2-D flat slabs, big DMAs, flat GEMM into the output ----
        b = b_flat
        x_flat = x.reshape(nc * h, w)                       # free reshape (contiguous)
        t_shape = (b * h_out, w) if h_first else (b * h, w_out)
        kernel = _make_flat_kernel(b, h, w, h_out, w_out, h_first, cdtype)

        out_flat = pl.pallas_call(
            kernel,
            out_shape=jax.ShapeDtypeStruct((nc * h_out, w_out), x.dtype),
            grid_spec=pltpu.PrefetchScalarGridSpec(
                num_scalar_prefetch=0,
                grid=(nc // b,),
                in_specs=[
                    pl.BlockSpec((h_out, h), lambda i: (0, 0)),      # A_h   (shared, no re-DMA)
                    pl.BlockSpec((w, w_out), lambda i: (0, 0)),      # A_w^T (shared, no re-DMA)
                    pl.BlockSpec((b * h, w), lambda i: (i, 0)),      # B input slices
                ],
                out_specs=pl.BlockSpec((b * h_out, w_out), lambda i: (i, 0)),
                scratch_shapes=[pltpu.VMEM(t_shape, jnp.float32)],
            ),
            compiler_params=cparams,
            cost_estimate=cost_est,
        )(a_h, a_w_t, x_flat)
        return out_flat.reshape(n, c, h_out, w_out)

    # ---- fallback path: 3-D per-slice blocks (always (8,128)-legal) ----
    b = _pick_batch_slices(nc, h, w, h_out, w_out, itemsize)
    x3 = x.reshape(nc, h, w)
    kernel = _make_slice_kernel(b, h_first, cdtype)

    out3 = pl.pallas_call(
        kernel,
        out_shape=jax.ShapeDtypeStruct((nc, h_out, w_out), x.dtype),
        grid_spec=pltpu.PrefetchScalarGridSpec(
            num_scalar_prefetch=0,
            grid=(nc // b,),
            in_specs=[
                pl.BlockSpec((h_out, h), lambda i: (0, 0)),
                pl.BlockSpec((w, w_out), lambda i: (0, 0)),
                pl.BlockSpec((b, h, w), lambda i: (i, 0, 0)),
            ],
            out_specs=pl.BlockSpec((b, h_out, w_out), lambda i: (i, 0, 0)),
        ),
        compiler_params=cparams,
        cost_estimate=cost_est,
    )(a_h, a_w_t, x3)
    return out3.reshape(n, c, h_out, w_out)


# ---------------------------------------------------------------------------
# Pure-JAX reference for sanity checking (same math, no Pallas).
# ---------------------------------------------------------------------------
def _reference(x, scale, mode):
    n, c, h, w = x.shape
    h_out, w_out = int(h * scale), int(w * scale)
    if mode == "bilinear":
        a_h = jnp.asarray(_bilinear_matrix(h_out, h, scale))
        a_w = jnp.asarray(_bilinear_matrix(w_out, w, scale))
    else:
        a_h = jnp.asarray(_nearest_matrix(h_out, h, scale))
        a_w = jnp.asarray(_nearest_matrix(w_out, w, scale))
    return jnp.einsum("oh,nchw,pw->ncop", a_h, x.astype(jnp.float32), a_w).astype(x.dtype)


if __name__ == "__main__":
    key = jax.random.PRNGKey(0)
    x = jax.random.normal(key, (2, 4, 16, 16), dtype=jnp.float32)

    out = interpolate(x, scale=2.0, mode="bilinear")
    out = jax.block_until_ready(out)
    assert out.shape == (2, 4, 32, 32), out.shape
    ref = _reference(x, 2.0, "bilinear")
    assert jnp.allclose(out, ref, atol=1e-5, rtol=1e-5)

    out_n = interpolate(x, scale=2.0, mode="nearest")
    out_n = jax.block_until_ready(out_n)
    ref_n = _reference(x, 2.0, "nearest")
    assert jnp.allclose(out_n, ref_n, atol=1e-5, rtol=1e-5)

    print("KERNEL_OK")
</pallas_src>

<mosaic_0001>
module attributes {stable_mosaic.version = 11 : i64} {
  func.func @kernel(%arg0: i32, %arg1: memref<32x16xf32, #tpu.memory_space<vmem>>, %arg2: memref<16x32xf32, #tpu.memory_space<vmem>>, %arg3: memref<128x16xf32, #tpu.memory_space<vmem>>, %arg4: memref<256x32xf32, #tpu.memory_space<vmem>>, %arg5: memref<256x16xf32, #tpu.memory_space<vmem>>) attributes {dimension_semantics = [#tpu.dimension_semantics<parallel>], iteration_bounds = array<i64: 1>, scalar_prefetch = 0 : i64, scratch_operands = 1 : i64, tpu.core_type = #tpu.core_type<tc>, window_params = [{pipeline_mode = #tpu.pipeline_mode<synchronous>, transform_indices = @transform_0, window_bounds = array<i64: 32, 16>}, {pipeline_mode = #tpu.pipeline_mode<synchronous>, transform_indices = @transform_1, window_bounds = array<i64: 16, 32>}, {transform_indices = @transform_2, window_bounds = array<i64: 128, 16>}, {transform_indices = @transform_3, window_bounds = array<i64: 256, 32>}]} {
    %c0 = arith.constant 0 : index
    %c0_0 = arith.constant 0 : index
    %0 = vector.load %arg1[%c0, %c0_0] : memref<32x16xf32, #tpu.memory_space<vmem>>, vector<32x16xf32>
    %c0_1 = arith.constant 0 : index
    %c0_2 = arith.constant 0 : index
    %1 = vector.load %arg2[%c0_1, %c0_2] : memref<16x32xf32, #tpu.memory_space<vmem>>, vector<16x32xf32>
    %c0_3 = arith.constant 0 : index
    %c0_4 = arith.constant 0 : index
    %2 = vector.load %arg3[%c0_3, %c0_4] : memref<128x16xf32, #tpu.memory_space<vmem>>, vector<16x16xf32>
    %cst = arith.constant dense<0.000000e+00> : vector<32x16xf32>
    %3 = tpu.matmul %0, %2, %cst {dimension_numbers = #tpu.dot_dimension_numbers<[1], [0], [0], [1], [0, 0, 1, 1], [], []>} : vector<32x16xf32>, vector<16x16xf32>, vector<32x16xf32> -> vector<32x16xf32>
    %c0_5 = arith.constant 0 : index
    %c0_6 = arith.constant 0 : index
    %4 = vector.load %arg5[%c0_5, %c0_6] : memref<256x16xf32, #tpu.memory_space<vmem>>, vector<32x16xf32>
    tpu.vector_store %arg5[%c0_5, %c0_6], %3 {strides = array<i32>} : memref<256x16xf32, #tpu.memory_space<vmem>>, vector<32x16xf32>,
    %c16 = arith.constant 16 : index
    %c0_7 = arith.constant 0 : index
    %5 = vector.load %arg3[%c16, %c0_7] : memref<128x16xf32, #tpu.memory_space<vmem>>, vector<16x16xf32>
    %cst_8 = arith.constant dense<0.000000e+00> : vector<32x16xf32>
    %6 = tpu.matmul %0, %5, %cst_8 {dimension_numbers = #tpu.dot_dimension_numbers<[1], [0], [0], [1], [0, 0, 1, 1], [], []>} : vector<32x16xf32>, vector<16x16xf32>, vector<32x16xf32> -> vector<32x16xf32>
    %c32 = arith.constant 32 : index
    %c0_9 = arith.constant 0 : index
    %7 = vector.load %arg5[%c32, %c0_9] : memref<256x16xf32, #tpu.memory_space<vmem>>, vector<32x16xf32>
    tpu.vector_store %arg5[%c32, %c0_9], %6 {strides = array<i32>} : memref<256x16xf32, #tpu.memory_space<vmem>>, vector<32x16xf32>,
    %c32_10 = arith.constant 32 : index
    %c0_11 = arith.constant 0 : index
    %8 = vector.load %arg3[%c32_10, %c0_11] : memref<128x16xf32, #tpu.memory_space<vmem>>, vector<16x16xf32>
    %cst_12 = arith.constant dense<0.000000e+00> : vector<32x16xf32>
    %9 = tpu.matmul %0, %8, %cst_12 {dimension_numbers = #tpu.dot_dimension_numbers<[1], [0], [0], [1], [0, 0, 1, 1], [], []>} : vector<32x16xf32>, vector<16x16xf32>, vector<32x16xf32> -> vector<32x16xf32>
    %c64 = arith.constant 64 : index
    %c0_13 = arith.constant 0 : index
    %10 = vector.load %arg5[%c64, %c0_13] : memref<256x16xf32, #tpu.memory_space<vmem>>, vector<32x16xf32>
    tpu.vector_store %arg5[%c64, %c0_13], %9 {strides = array<i32>} : memref<256x16xf32, #tpu.memory_space<vmem>>, vector<32x16xf32>,
    %c48 = arith.constant 48 : index
    %c0_14 = arith.constant 0 : index
    %11 = vector.load %arg3[%c48, %c0_14] : memref<128x16xf32, #tpu.memory_space<vmem>>, vector<16x16xf32>
    %cst_15 = arith.constant dense<0.000000e+00> : vector<32x16xf32>
    %12 = tpu.matmul %0, %11, %cst_15 {dimension_numbers = #tpu.dot_dimension_numbers<[1], [0], [0], [1], [0, 0, 1, 1], [], []>} : vector<32x16xf32>, vector<16x16xf32>, vector<32x16xf32> -> vector<32x16xf32>
    %c96 = arith.constant 96 : index
    %c0_16 = arith.constant 0 : index
    %13 = vector.load %arg5[%c96, %c0_16] : memref<256x16xf32, #tpu.memory_space<vmem>>, vector<32x16xf32>
    tpu.vector_store %arg5[%c96, %c0_16], %12 {strides = array<i32>} : memref<256x16xf32, #tpu.memory_space<vmem>>, vector<32x16xf32>,
    %c64_17 = arith.constant 64 : index
    %c0_18 = arith.constant 0 : index
    %14 = vector.load %arg3[%c64_17, %c0_18] : memref<128x16xf32, #tpu.memory_space<vmem>>, vector<16x16xf32>
    %cst_19 = arith.constant dense<0.000000e+00> : vector<32x16xf32>
    %15 = tpu.matmul %0, %14, %cst_19 {dimension_numbers = #tpu.dot_dimension_numbers<[1], [0], [0], [1], [0, 0, 1, 1], [], []>} : vector<32x16xf32>, vector<16x16xf32>, vector<32x16xf32> -> vector<32x16xf32>
    %c128 = arith.constant 128 : index
    %c0_20 = arith.constant 0 : index
    %16 = vector.load %arg5[%c128, %c0_20] : memref<256x16xf32, #tpu.memory_space<vmem>>, vector<32x16xf32>
    tpu.vector_store %arg5[%c128, %c0_20], %15 {strides = array<i32>} : memref<256x16xf32, #tpu.memory_space<vmem>>, vector<32x16xf32>,
    %c80 = arith.constant 80 : index
    %c0_21 = arith.constant 0 : index
    %17 = vector.load %arg3[%c80, %c0_21] : memref<128x16xf32, #tpu.memory_space<vmem>>, vector<16x16xf32>
    %cst_22 = arith.constant dense<0.000000e+00> : vector<32x16xf32>
    %18 = tpu.matmul %0, %17, %cst_22 {dimension_numbers = #tpu.dot_dimension_numbers<[1], [0], [0], [1], [0, 0, 1, 1], [], []>} : vector<32x16xf32>, vector<16x16xf32>, vector<32x16xf32> -> vector<32x16xf32>
    %c160 = arith.constant 160 : index
    %c0_23 = arith.constant 0 : index
    %19 = vector.load %arg5[%c160, %c0_23] : memref<256x16xf32, #tpu.memory_space<vmem>>, vector<32x16xf32>
    tpu.vector_store %arg5[%c160, %c0_23], %18 {strides = array<i32>} : memref<256x16xf32, #tpu.memory_space<vmem>>, vector<32x16xf32>,
    %c96_24 = arith.constant 96 : index
    %c0_25 = arith.constant 0 : index
    %20 = vector.load %arg3[%c96_24, %c0_25] : memref<128x16xf32, #tpu.memory_space<vmem>>, vector<16x16xf32>
    %cst_26 = arith.constant dense<0.000000e+00> : vector<32x16xf32>
    %21 = tpu.matmul %0, %20, %cst_26 {dimension_numbers = #tpu.dot_dimension_numbers<[1], [0], [0], [1], [0, 0, 1, 1], [], []>} : vector<32x16xf32>, vector<16x16xf32>, vector<32x16xf32> -> vector<32x16xf32>
    %c192 = arith.constant 192 : index
    %c0_27 = arith.constant 0 : index
    %22 = vector.load %arg5[%c192, %c0_27] : memref<256x16xf32, #tpu.memory_space<vmem>>, vector<32x16xf32>
    tpu.vector_store %arg5[%c192, %c0_27], %21 {strides = array<i32>} : memref<256x16xf32, #tpu.memory_space<vmem>>, vector<32x16xf32>,
    %c112 = arith.constant 112 : index
    %c0_28 = arith.constant 0 : index
    %23 = vector.load %arg3[%c112, %c0_28] : memref<128x16xf32, #tpu.memory_space<vmem>>, vector<16x16xf32>
    %cst_29 = arith.constant dense<0.000000e+00> : vector<32x16xf32>
    %24 = tpu.matmul %0, %23, %cst_29 {dimension_numbers = #tpu.dot_dimension_numbers<[1], [0], [0], [1], [0, 0, 1, 1], [], []>} : vector<32x16xf32>, vector<16x16xf32>, vector<32x16xf32> -> vector<32x16xf32>
    %c224 = arith.constant 224 : index
    %c0_30 = arith.constant 0 : index
    %25 = vector.load %arg5[%c224, %c0_30] : memref<256x16xf32, #tpu.memory_space<vmem>>, vector<32x16xf32>
    tpu.vector_store %arg5[%c224, %c0_30], %24 {strides = array<i32>} : memref<256x16xf32, #tpu.memory_space<vmem>>, vector<32x16xf32>,
    %c0_31 = arith.constant 0 : index
    %c0_32 = arith.constant 0 : index
    %26 = vector.load %arg5[%c0_31, %c0_32] : memref<256x16xf32, #tpu.memory_space<vmem>>, vector<256x16xf32>
    %cst_33 = arith.constant dense<0.000000e+00> : vector<256x32xf32>
    %27 = tpu.matmul %26, %1, %cst_33 {dimension_numbers = #tpu.dot_dimension_numbers<[1], [0], [0], [1], [0, 0, 1, 1], [], []>} : vector<256x16xf32>, vector<16x32xf32>, vector<256x32xf32> -> vector<256x32xf32>
    %c0_34 = arith.constant 0 : index
    %c0_35 = arith.constant 0 : index
    %28 = vector.load %arg4[%c0_34, %c0_35] : memref<256x32xf32, #tpu.memory_space<vmem>>, vector<256x32xf32>
    tpu.vector_store %arg4[%c0_34, %c0_35], %27 {strides = array<i32>} : memref<256x32xf32, #tpu.memory_space<vmem>>, vector<256x32xf32>,
    return
  }
  func.func @transform_0(%arg0: i32) -> (i32, i32) {
    %c0_i32 = arith.constant 0 : i32
    %c0_i32_0 = arith.constant 0 : i32
    %c0_i32_1 = arith.constant 0 : i32
    return %c0_i32, %c0_i32_0 : i32, i32
  }
  func.func @transform_1(%arg0: i32) -> (i32, i32) {
    %c0_i32 = arith.constant 0 : i32
    %c0_i32_0 = arith.constant 0 : i32
    %c0_i32_1 = arith.constant 0 : i32
    return %c0_i32, %c0_i32_0 : i32, i32
  }
  func.func @transform_2(%arg0: i32) -> (i32, i32) {
    %c0_i32 = arith.constant 0 : i32
    %c0_i32_0 = arith.constant 0 : i32
    return %arg0, %c0_i32 : i32, i32
  }
  func.func @transform_3(%arg0: i32) -> (i32, i32) {
    %c0_i32 = arith.constant 0 : i32
    %c0_i32_0 = arith.constant 0 : i32
    return %arg0, %c0_i32 : i32, i32
  }
}

</mosaic_0001>

<bundles_post_ra>
// kernel: interpolate.1
= control target key start
LH: loop header
LB: loop body
LE: loop exit
PB: predicated region body
PF: predicated region fallthrough
CT: control target
= control target key end

     0   :  { %8 = vsyncpa [#allocation4], 0  ;;  %s1789_s0 = inlined_call_operand.hbm [shape: f32[32,16], index: 0, kind: input, shape index: {}]   ;;  %s1790_s1 = inlined_call_operand.hbm [shape: f32[16,32], index: 1, kind: input, shape index: {}]   ;;  %s1791_s2 = inlined_call_operand.hbm [shape: f32[128,16], index: 2, kind: input, shape index: {}]   ;;  %s1792_s3 = inlined_call_operand.hbm [shape: f32[256,32], index: 3, kind: output, shape index: {}]  }
   0x1   :  { %9 = vsyncpa [#allocation7], 0 }
   0x2   :  { %10 = vsyncpa [#allocation5], 0  ;;  %s1581_s12 = smov [#allocation6]   ;;  %s1582_s14 = smov [#allocation3]  }
   0x3   :  { %s28_s13 = sshll.u32 %s1581_s12, 4  ;;  %s16_s15 = sshll.u32 %s1582_s14, 4  ;;  %s29_s13 = int_to_ptr.vmem [resolvable:$true] %s28_s13  ;;  %s17_s15 = int_to_ptr.vmem [resolvable:$true] %s16_s15 }
   0x4   :  { %s1503_s16 = scalar_lea.vmem %s29_s13, 256  ;;  %p1508_p1 = scmp.lt.s32.totalorder %s29_s13, %s29_s13 }
   0x5   :  { %p1504_p0 = scmp.ne.s32.totalorder %s29_s13, %s1503_s16  ;;  %p1509_p2 = scmp.lt.s32.totalorder %s1503_s16, %s1503_s16 }
   0x7   :  { %p1510_p3 = por %p1509_p2, %p1508_p1 }
   0x9   :  { %p1511_p4 = pnand %p1510_p3, %p1504_p0 }
   0xb   :  { %1514 = shalt.err (!%p1511_p4)
}
   0xc   :  { %s1583_s17 = smov 128   ;;  %s1584_s18 = smov 8  }
   0xd   :  { %34 = dma.hbm_to_vmem [thread:$0]  %s1790_s1, 256, %s29_s13, [#allocation7], %s1583_s17, %s1583_s17, %s1584_s18  }
   0xe   :  { %s1523_s21 = scalar_lea.vmem %s17_s15, 512  ;;  %p1528_p6 = scmp.lt.s32.totalorder %s17_s15, %s17_s15 }
   0xf   :  { %p1524_p5 = scmp.ne.s32.totalorder %s17_s15, %s1523_s21  ;;  %p1529_p7 = scmp.lt.s32.totalorder %s1523_s21, %s1523_s21 }
  0x11   :  { %p1530_p8 = por %p1529_p7, %p1528_p6 }
  0x13   :  { %p1531_p9 = pnand %p1530_p8, %p1524_p5 }
  0x15   :  { %1534 = shalt.err (!%p1531_p9)
}
  0x16   :  { %22 = dma.hbm_to_vmem [thread:$0]  %s1789_s0, 512, %s17_s15, [#allocation4], %s1583_s17, %s1583_s17, %s1584_s18  }
  0x17   :  { %s1585_s24 = smov [#allocation8]  }
  0x18   :  { %s40_s25 = sshll.u32 %s1585_s24, 4  ;;  %s41_s25 = int_to_ptr.vmem [resolvable:$true] %s40_s25 }
  0x19   :  { %s1543_s26 = scalar_lea.vmem %s41_s25, 2048  ;;  %p1548_p11 = scmp.lt.s32.totalorder %s41_s25, %s41_s25 }
  0x1a   :  { %p1544_p10 = scmp.ne.s32.totalorder %s41_s25, %s1543_s26  ;;  %p1549_p12 = scmp.lt.s32.totalorder %s1543_s26, %s1543_s26 }
  0x1c   :  { %p1550_p13 = por %p1549_p12, %p1548_p11 }
  0x1e   :  { %p1551_p0 = pnand %p1550_p13, %p1544_p10 }
  0x20   :  { %1554 = shalt.err (!%p1551_p0)
}
  0x21   :  { %46 = dma.hbm_to_vmem [thread:$0]  %s1791_s2, 2048, %s41_s25, [#allocation7], %s1583_s17, %s1583_s17, %s1584_s18  }
  0x22   :  { %1575 = dma.done.wait [#allocation4], 512  }
  0x23   :  { %1576 = vsyncadd [#allocation4], 4294966784 }
  0x24   :  { %1577 = dma.done.wait [#allocation7], 2304  }
  0x25   :  { %1578 = vsyncadd [#allocation7], 4294964992  ;;  %vm64_vm0 = vcmask 130048   ;;  %v63_v0 = vld [vmem:[#allocation8 + $0x8] sm:$0xff]  ;;  %v62_v1 = vld [vmem:[#allocation8] sm:$0xff]  ;;  %vm1156_vm1 = vcmask 261120  }
  0x26   :  { %v1625_v2 = vld [vmem:[#allocation3] sm:$0xff]  ;;  %1353 = vmatprep.subr.mxu0 %v63_v0  ;;  %v1629_v3 = vld [vmem:[#allocation3 + $0x8] sm:$0xff]  ;;  %v258_v4 = vld [vmem:[#allocation8 + $0x28] sm:$0xff]  ;;  %s1586_s0 = smov [#allocation9]  }
  0x27   :  { %1357 = vmatprep.mubr.msk.f32.mxu0 %vm64_vm0, %v1625_v2  ;;  %1354 = vmatpush3.msra.mxu0 %v63_v0  ;;  %v167_v5 = vld [vmem:[#allocation8 + $0x18] sm:$0xff]  ;;  %v1633_v6 = vld [vmem:[#allocation3 + $0x10] sm:$0xff]  ;;  %v166_v8 = vld [vmem:[#allocation8 + $0x10] sm:$0xff]  ;;  %s1194_s2 = sshll.u32 %s1586_s0, 4  ;;  %s1195_s2 = int_to_ptr.vmem [resolvable:$true] %s1194_s2 }
  0x28   :  { %1367 = vmatprep.mubr.msk.f32.mxu1 %vm64_vm0, %v1625_v2  ;;  %1355 = vmatprep.subr.mxu0 %v62_v1  ;;  %v257_v7 = vld [vmem:[#allocation8 + $0x20] sm:$0xff]  ;;  %v59_v9 = vld [vmem:[#allocation3 + $0x18] sm:$0xff]  ;;  %v349_v10 = vld [vmem:[#allocation8 + $0x38] sm:$0xff]  ;;  %s1555_s28 = scalar_lea.vmem %s1195_s2, 4096  ;;  %p1560_p2 = scmp.lt.s32.totalorder %s1195_s2, %s1195_s2 }
  0x29   :  { %1363 = vmatprep.subr.mxu1 %v167_v5  ;;  %1356 = vmatpush3.msra.mxu0 %v62_v1  ;;  %v440_v11 = vld [vmem:[#allocation8 + $0x48] sm:$0xff]  ;;  %v348_v12 = vld [vmem:[#allocation8 + $0x30] sm:$0xff]  ;;  %v439_v13 = vld [vmem:[#allocation8 + $0x40] sm:$0xff]  ;;  %p1556_p1 = scmp.ne.s32.totalorder %s1195_s2, %s1555_s28  ;;  %p1561_p3 = scmp.lt.s32.totalorder %s1555_s28, %s1555_s28 }
  0x2a   :  { %1364 = vmatpush3.msra.mxu1 %v167_v5  ;;  %1358 = vmatmul.mubr.msk.f32.vlgmr.msra.gmra.mxu0 %vm64_vm0, %v1629_v3  ;;  %v531_v14 = vld [vmem:[#allocation8 + $0x58] sm:$0xff]  ;;  %v530_v15 = vld [vmem:[#allocation8 + $0x50] sm:$0xff]  ;;  %v622_v16 = vld [vmem:[#allocation8 + $0x68] sm:$0xff] }
  0x2b   :  { %1373 = vmatprep.subr.mxu0 %v258_v4  ;;  %1360 = vmatprep.mubr.msk.f32.mxu0 %vm64_vm0, %v1633_v6  ;;  %v621_v17 = vld [vmem:[#allocation8 + $0x60] sm:$0xff]  ;;  %v713_v18 = vld [vmem:[#allocation8 + $0x78] sm:$0xff]  ;;  %v712_v19 = vld [vmem:[#allocation8 + $0x70] sm:$0xff]  ;;  %p1562_p4 = por %p1561_p3, %p1560_p2 }
  0x2c   :  { %1374 = vmatpush3.msra.mxu0 %v258_v4  ;;  %1365 = vmatprep.subr.mxu1 %v166_v8  ;;  %v61_v20 = vld [vmem:[#allocation6 + $0x8] sm:$0xff]  ;;  %v60_v21 = vld [vmem:[#allocation6] sm:$0xff] }
  0x2d   :  { %1375 = vmatprep.subr.mxu0 %v257_v7  ;;  %1366 = vmatpush3.msra.mxu1 %v166_v8  ;;  %p1563_p5 = pnand %p1562_p4, %p1556_p1 }
  0x2e   :  { %1376 = vmatpush3.msra.mxu0 %v257_v7  ;;  %1368 = vmatmul.mubr.msk.f32.vlgmr.msra.gmra.mxu1 %vm64_vm0, %v1629_v3 }
  0x2f   :  { %1361 = vmatmul.mubr.msk.f32.gmra.mxu0 %vm64_vm0, %v59_v9  ;;  %1383 = vmatprep.subr.mxu1 %v349_v10 }
  0x30   :  { %1377 = vmatprep.mubr.msk.f32.mxu0 %vm64_vm0, %v1625_v2  ;;  %1393 = vmatprep.subr.mxu0 %v440_v11 }
  0x31   :  { %1384 = vmatpush3.msra.mxu1 %v349_v10  ;;  %1370 = vmatprep.mubr.msk.f32.mxu1 %vm64_vm0, %v1633_v6 }
  0x32   :  { %1385 = vmatprep.subr.mxu1 %v348_v12  ;;  %1371 = vmatmul.mubr.msk.f32.gmra.mxu1 %vm64_vm0, %v59_v9 }
  0x33   :  { %1378 = vmatmul.mubr.msk.f32.vlgmr.msra.gmra.mxu0 %vm64_vm0, %v1629_v3  ;;  %1386 = vmatpush3.msra.mxu1 %v348_v12 }
  0x34   :  { %1394 = vmatpush3.msra.mxu0 %v440_v11  ;;  %1380 = vmatprep.mubr.msk.f32.mxu0 %vm64_vm0, %v1633_v6 }
  0x35   :  { %1395 = vmatprep.subr.mxu0 %v439_v13  ;;  %1387 = vmatprep.mubr.msk.f32.mxu1 %vm64_vm0, %v1625_v2 }
  0x36   :  { %1396 = vmatpush3.msra.mxu0 %v439_v13  ;;  %1388 = vmatmul.mubr.msk.f32.vlgmr.msra.gmra.mxu1 %vm64_vm0, %v1629_v3 }
  0x37   :  { %1381 = vmatmul.mubr.msk.f32.gmra.mxu0 %vm64_vm0, %v59_v9  ;;  %1403 = vmatprep.subr.mxu1 %v531_v14 }
  0x38   :  { %1397 = vmatprep.mubr.msk.f32.mxu0 %vm64_vm0, %v1625_v2  ;;  %1404 = vmatpush3.msra.mxu1 %v531_v14 }
  0x39   :  { %1390 = vmatprep.mubr.msk.f32.mxu1 %vm64_vm0, %v1633_v6  ;;  %1405 = vmatprep.subr.mxu1 %v530_v15 }
  0x3a   :  { %1413 = vmatprep.subr.mxu0 %v622_v16  ;;  %1391 = vmatmul.mubr.msk.f32.gmra.mxu1 %vm64_vm0, %v59_v9 }
  0x3b   :  { %1398 = vmatmul.mubr.msk.f32.vlgmr.msra.gmra.mxu0 %vm64_vm0, %v1629_v3  ;;  %1406 = vmatpush3.msra.mxu1 %v530_v15 }
  0x3c   :  { %1400 = vmatprep.mubr.msk.f32.mxu0 %vm64_vm0, %v1633_v6  ;;  %1407 = vmatprep.mubr.msk.f32.mxu1 %vm64_vm0, %v1625_v2 }
  0x3d   :  { %1414 = vmatpush3.msra.mxu0 %v622_v16  ;;  %1423 = vmatprep.subr.mxu1 %v713_v18 }
  0x3e   :  { %1415 = vmatprep.subr.mxu0 %v621_v17  ;;  %1408 = vmatmul.mubr.msk.f32.vlgmr.msra.gmra.mxu1 %vm64_vm0, %v1629_v3 }
  0x3f   :  { %1401 = vmatmul.mubr.msk.f32.gmra.mxu0 %vm64_vm0, %v59_v9  ;;  %1410 = vmatprep.mubr.msk.f32.mxu1 %vm64_vm0, %v1633_v6 }
  0x40   :  { %1416 = vmatpush3.msra.mxu0 %v621_v17  ;;  %1417 = vmatprep.mubr.msk.f32.mxu0 %vm64_vm0, %v1625_v2 }
  0x41   :  { %1424 = vmatpush3.msra.mxu1 %v713_v18  ;;  %1433 = vmatprep.subr.mxu0 %v61_v20 }
  0x42   :  { %1425 = vmatprep.subr.mxu1 %v712_v19  ;;  %1411 = vmatmul.mubr.msk.f32.gmra.mxu1 %vm64_vm0, %v59_v9 }
  0x43   :  { %1418 = vmatmul.mubr.msk.f32.vlgmr.msra.gmra.mxu0 %vm64_vm0, %v1629_v3  ;;  %1426 = vmatpush3.msra.mxu1 %v712_v19 }
  0x44   :  { %1420 = vmatprep.mubr.msk.f32.mxu0 %vm64_vm0, %v1633_v6  ;;  %1427 = vmatprep.mubr.msk.f32.mxu1 %vm64_vm0, %v1625_v2 }
  0x45   :  { %1485 = vmatprep.subr.mxu1 %v61_v20  ;;  %1434 = vmatpush3.msra.mxu0 %v61_v20 }
  0x46   :  { %1428 = vmatmul.mubr.msk.f32.vlgmr.msra.gmra.mxu1 %vm64_vm0, %v1629_v3  ;;  %1435 = vmatprep.subr.mxu0 %v60_v21 }
  0x47   :  { %1421 = vmatmul.mubr.msk.f32.gmra.mxu0 %vm64_vm0, %v59_v9  ;;  %1430 = vmatprep.mubr.msk.f32.mxu1 %vm64_vm0, %v1633_v6 }
  0x48   :  { %1487 = vmatpush3.msra.mxu1 %v61_v20  ;;  %1436 = vmatpush3.msra.mxu0 %v60_v21 }
  0x49   :  { %1486 = vmatprep.subr.mxu1 %v60_v21 }
  0x4a   :  { %1431 = vmatmul.mubr.msk.f32.gmra.mxu1 %vm64_vm0, %v59_v9 }
  0x4b   :  { %1488 = vmatpush3.msra.mxu1 %v60_v21 }
  0xea   :  { %v1359_v22 = vpop.f32.mrf.mxu0 }
  0xeb   :  { %163 = vst.msk [vmem:[#allocation2 + $0x8] sm:$0xff] %vm64_vm0, %v1359_v22 }
  0xec   :  { %v143_v23 = vpop.f32.mrf.mxu0 }
  0xed   :  { %162 = vst.msk [vmem:[#allocation2] sm:$0xff] %vm64_vm0, %v143_v23 }
  0xee   :  { %v1369_v25 = vpop.f32.mrf.mxu1 }
  0xef   :  { %v1362_v24 = vpop.f32.mrf.mxu0  ;;  %254 = vst.msk [vmem:[#allocation2 + $0x28] sm:$0xff] %vm64_vm0, %v1369_v25 }
  0xf0   :  { %165 = vst.msk [vmem:[#allocation2 + $0x18] sm:$0xff] %vm64_vm0, %v1362_v24  ;;  %v234_v27 = vpop.f32.mrf.mxu1 }
  0xf1   :  { %v153_v26 = vpop.f32.mrf.mxu0  ;;  %253 = vst.msk [vmem:[#allocation2 + $0x20] sm:$0xff] %vm64_vm0, %v234_v27 }
  0xf2   :  { %164 = vst.msk [vmem:[#allocation2 + $0x10] sm:$0xff] %vm64_vm0, %v153_v26  ;;  %v1372_v29 = vpop.f32.mrf.mxu1  ;;  %v804_v33 = vld [vmem:[#allocation2 + $0x8] sm:$0xff] }
  0xf3   :  { %v1379_v28 = vpop.f32.mrf.mxu0  ;;  %256 = vst.msk [vmem:[#allocation2 + $0x38] sm:$0xff] %vm64_vm0, %v1372_v29 }
  0xf4   :  { %345 = vst.msk [vmem:[#allocation2 + $0x48] sm:$0xff] %vm64_vm0, %v1379_v28  ;;  %v803_v31 = vld [vmem:[#allocation2] sm:$0xff]  ;;  %v244_v32 = vpop.f32.mrf.mxu1 }
  0xf5   :  { %v325_v30 = vpop.f32.mrf.mxu0  ;;  %1437 = vmatprep.mubr.msk.f32.mxu0 %vm64_vm0, %v803_v31  ;;  %255 = vst.msk [vmem:[#allocation2 + $0x30] sm:$0xff] %vm64_vm0, %v244_v32 }
  0xf6   :  { %344 = vst.msk [vmem:[#allocation2 + $0x40] sm:$0xff] %vm64_vm0, %v325_v30  ;;  %1438 = vmatmul.mubr.msk.f32.vlgmr.msra.gmra.mxu0 %vm64_vm0, %v804_v33  ;;  %v1389_v35 = vpop.f32.mrf.mxu1  ;;  %v808_v46 = vld [vmem:[#allocation2 + $0x28] sm:$0xff] }
  0xf7   :  { %v1382_v34 = vpop.f32.mrf.mxu0  ;;  %436 = vst.msk [vmem:[#allocation2 + $0x68] sm:$0xff] %vm64_vm0, %v1389_v35  ;;  %v806_v40 = vld [vmem:[#allocation2 + $0x18] sm:$0xff] }
  0xf8   :  { %347 = vst.msk [vmem:[#allocation2 + $0x58] sm:$0xff] %vm64_vm0, %v1382_v34  ;;  %v416_v38 = vpop.f32.mrf.mxu1  ;;  %v807_v39 = vld [vmem:[#allocation2 + $0x20] sm:$0xff] }
  0xf9   :  { %v335_v36 = vpop.f32.mrf.mxu0  ;;  %v805_v37 = vld [vmem:[#allocation2 + $0x10] sm:$0xff]  ;;  %435 = vst.msk [vmem:[#allocation2 + $0x60] sm:$0xff] %vm64_vm0, %v416_v38 }
  0xfa   :  { %346 = vst.msk [vmem:[#allocation2 + $0x50] sm:$0xff] %vm64_vm0, %v335_v36  ;;  %1440 = vmatprep.mubr.msk.f32.mxu0 %vm64_vm0, %v805_v37  ;;  %v1392_v42 = vpop.f32.mrf.mxu1  ;;  %v810_v51 = vld [vmem:[#allocation2 + $0x38] sm:$0xff] }
  0xfb   :  { %v1399_v41 = vpop.f32.mrf.mxu0  ;;  %1441 = vmatmul.mubr.msk.f32.gmra.mxu0 %vm64_vm0, %v806_v40  ;;  %438 = vst.msk [vmem:[#allocation2 + $0x78] sm:$0xff] %vm64_vm0, %v1392_v42  ;;  %v812_v58 = vld [vmem:[#allocation2 + $0x48] sm:$0xff] }
  0xfc   :  { %527 = vst.msk [vmem:[#allocation2 + $0x88] sm:$0xff] %vm64_vm0, %v1399_v41  ;;  %1443 = vmatprep.mubr.msk.f32.mxu0 %vm64_vm0, %v807_v39  ;;  %v426_v44 = vpop.f32.mrf.mxu1  ;;  %v809_v45 = vld [vmem:[#allocation2 + $0x30] sm:$0xff] }
  0xfd   :  { %v507_v43 = vpop.f32.mrf.mxu0  ;;  %437 = vst.msk [vmem:[#allocation2 + $0x70] sm:$0xff] %vm64_vm0, %v426_v44  ;;  %v811_v52 = vld [vmem:[#allocation2 + $0x40] sm:$0xff] }
  0xfe   :  { %526 = vst.msk [vmem:[#allocation2 + $0x80] sm:$0xff] %vm64_vm0, %v507_v43  ;;  %v1409_v48 = vpop.f32.mrf.mxu1  ;;  %v816_v9 = vld [vmem:[#allocation2 + $0x68] sm:$0xff] }
  0xff   :  { %v1402_v47 = vpop.f32.mrf.mxu0  ;;  %1444 = vmatmul.mubr.msk.f32.gmra.mxu0 %vm64_vm0, %v808_v46  ;;  %618 = vst.msk [vmem:[#allocation2 + $0xa8] sm:$0xff] %vm64_vm0, %v1409_v48  ;;  %v814_v3 = vld [vmem:[#allocation2 + $0x58] sm:$0xff] }
 0x100   :  { %529 = vst.msk [vmem:[#allocation2 + $0x98] sm:$0xff] %vm64_vm0, %v1402_v47  ;;  %1446 = vmatprep.mubr.msk.f32.mxu0 %vm64_vm0, %v809_v45  ;;  %v598_v50 = vpop.f32.mrf.mxu1  ;;  %v815_v5 = vld [vmem:[#allocation2 + $0x60] sm:$0xff] }
 0x101   :  { %v517_v49 = vpop.f32.mrf.mxu0  ;;  %617 = vst.msk [vmem:[#allocation2 + $0xa0] sm:$0xff] %vm64_vm0, %v598_v50  ;;  %v813_v60 = vld [vmem:[#allocation2 + $0x50] sm:$0xff] }
 0x102   :  { %528 = vst.msk [vmem:[#allocation2 + $0x90] sm:$0xff] %vm64_vm0, %v517_v49  ;;  %v1412_v53 = vpop.f32.mrf.mxu1  ;;  %v818_v13 = vld [vmem:[#allocation2 + $0x78] sm:$0xff] }
 0x103   :  { %1447 = vmatmul.mubr.msk.f32.gmra.mxu0 %vm64_vm0, %v810_v51  ;;  %v1419_v54 = vpop.f32.mrf.mxu0  ;;  %620 = vst.msk [vmem:[#allocation2 + $0xb8] sm:$0xff] %vm64_vm0, %v1412_v53  ;;  %v820_v59 = vld [vmem:[#allocation2 + $0x88] sm:$0xff] }
 0x104   :  { %1449 = vmatprep.mubr.msk.f32.mxu0 %vm64_vm0, %v811_v52  ;;  %709 = vst.msk [vmem:[#allocation2 + $0xc8] sm:$0xff] %vm64_vm0, %v1419_v54  ;;  %v608_v56 = vpop.f32.mrf.mxu1  ;;  %v817_v11 = vld [vmem:[#allocation2 + $0x70] sm:$0xff] }
 0x105   :  { %v819_v55 = vld [vmem:[#allocation2 + $0x80] sm:$0xff]  ;;  %v689_v57 = vpop.f32.mrf.mxu0  ;;  %619 = vst.msk [vmem:[#allocation2 + $0xb0] sm:$0xff] %vm64_vm0, %v608_v56 }
 0x106   :  { %1461 = vmatprep.mubr.msk.f32.mxu1 %vm64_vm0, %v819_v55  ;;  %708 = vst.msk [vmem:[#allocation2 + $0xc0] sm:$0xff] %vm64_vm0, %v689_v57  ;;  %v1429_v62 = vpop.f32.mrf.mxu1  ;;  %v824_v10 = vld [vmem:[#allocation2 + $0xa8] sm:$0xff] }
 0x107   :  { %1450 = vmatmul.mubr.msk.f32.gmra.mxu0 %vm64_vm0, %v812_v58  ;;  %1462 = vmatmul.mubr.msk.f32.vlgmr.msra.gmra.mxu1 %vm64_vm0, %v820_v59  ;;  %v1422_v61 = vpop.f32.mrf.mxu0  ;;  %800 = vst.msk [vmem:[#allocation2 + $0xe8] sm:$0xff] %vm64_vm0, %v1429_v62  ;;  %v822_v4 = vld [vmem:[#allocation2 + $0x98] sm:$0xff] }
 0x108   :  { %1452 = vmatprep.mubr.msk.f32.mxu0 %vm64_vm0, %v813_v60  ;;  %711 = vst.msk [vmem:[#allocation2 + $0xd8] sm:$0xff] %vm64_vm0, %v1422_v61  ;;  %v823_v0 = vld [vmem:[#allocation2 + $0xa0] sm:$0xff]  ;;  %v780_v2 = vpop.f32.mrf.mxu1 }
 0x109   :  { %v821_v63 = vld [vmem:[#allocation2 + $0x90] sm:$0xff]  ;;  %v699_v1 = vpop.f32.mrf.mxu0  ;;  %799 = vst.msk [vmem:[#allocation2 + $0xe0] sm:$0xff] %vm64_vm0, %v780_v2 }
 0x10a   :  { %1464 = vmatprep.mubr.msk.f32.mxu1 %vm64_vm0, %v821_v63  ;;  %710 = vst.msk [vmem:[#allocation2 + $0xd0] sm:$0xff] %vm64_vm0, %v699_v1  ;;  %v1432_v6 = vpop.f32.mrf.mxu1  ;;  %v826_v14 = vld [vmem:[#allocation2 + $0xb8] sm:$0xff] }
 0x10b   :  { %1453 = vmatmul.mubr.msk.f32.gmra.mxu0 %vm64_vm0, %v814_v3  ;;  %1465 = vmatmul.mubr.msk.f32.gmra.mxu1 %vm64_vm0, %v822_v4  ;;  %802 = vst.msk [vmem:[#allocation2 + $0xf8] sm:$0xff] %vm64_vm0, %v1432_v6  ;;  %v828_v16 = vld [vmem:[#allocation2 + $0xc8] sm:$0xff] }
 0x10c   :  { %1455 = vmatprep.mubr.msk.f32.mxu0 %vm64_vm0, %v815_v5  ;;  %1467 = vmatprep.mubr.msk.f32.mxu1 %vm64_vm0, %v823_v0  ;;  %v825_v7 = vld [vmem:[#allocation2 + $0xb0] sm:$0xff]  ;;  %v790_v8 = vpop.f32.mrf.mxu1 }
 0x10d   :  { %801 = vst.msk [vmem:[#allocation2 + $0xf0] sm:$0xff] %vm64_vm0, %v790_v8  ;;  %v827_v12 = vld [vmem:[#allocation2 + $0xc0] sm:$0xff] }
 0x10e   :  { %v832_v20 = vld [vmem:[#allocation2 + $0xe8] sm:$0xff] }
 0x10f   :  { %1456 = vmatmul.mubr.msk.f32.gmra.mxu0 %vm64_vm0, %v816_v9  ;;  %1468 = vmatmul.mubr.msk.f32.gmra.mxu1 %vm64_vm0, %v824_v10  ;;  %v830_v18 = vld [vmem:[#allocation2 + $0xd8] sm:$0xff] }
 0x110   :  { %1458 = vmatprep.mubr.msk.f32.mxu0 %vm64_vm0, %v817_v11  ;;  %1470 = vmatprep.mubr.msk.f32.mxu1 %vm64_vm0, %v825_v7  ;;  %v831_v17 = vld [vmem:[#allocation2 + $0xe0] sm:$0xff] }
 0x111   :  { %v829_v15 = vld [vmem:[#allocation2 + $0xd0] sm:$0xff] }
 0x112   :  { %v834_v21 = vld [vmem:[#allocation2 + $0xf8] sm:$0xff] }
 0x113   :  { %1459 = vmatmul.mubr.msk.f32.gmra.mxu0 %vm64_vm0, %v818_v13  ;;  %1471 = vmatmul.mubr.msk.f32.gmra.mxu1 %vm64_vm0, %v826_v14 }
 0x114   :  { %1473 = vmatprep.mubr.msk.f32.mxu1 %vm64_vm0, %v827_v12  ;;  %v833_v19 = vld [vmem:[#allocation2 + $0xf0] sm:$0xff] }
 0x117   :  { %1474 = vmatmul.mubr.msk.f32.gmra.mxu1 %vm64_vm0, %v828_v16 }
 0x118   :  { %1476 = vmatprep.mubr.msk.f32.mxu1 %vm64_vm0, %v829_v15 }
 0x11b   :  { %1477 = vmatmul.mubr.msk.f32.gmra.mxu1 %vm64_vm0, %v830_v18 }
 0x11c   :  { %1479 = vmatprep.mubr.msk.f32.mxu1 %vm64_vm0, %v831_v17 }
 0x11f   :  { %1480 = vmatmul.mubr.msk.f32.gmra.mxu1 %vm64_vm0, %v832_v20 }
 0x120   :  { %1482 = vmatprep.mubr.msk.f32.mxu1 %vm64_vm0, %v833_v19 }
 0x123   :  { %1483 = vmatmul.mubr.msk.f32.gmra.mxu1 %vm64_vm0, %v834_v21 }
 0x1b6   :  { %v1439_v22 = vpop.f32.mrf.mxu0 }
 0x1b7   :  { %1158 = vst.msk [vmem:[#allocation9 + $0x8] sm:$0xff] %vm1156_vm1, %v1439_v22 }
 0x1b8   :  { %v997_v23 = vpop.f32.mrf.mxu0 }
 0x1b9   :  { %1157 = vst.msk [vmem:[#allocation9] sm:$0xff] %vm1156_vm1, %v997_v23 }
 0x1bb   :  { %v1442_v24 = vpop.f32.mrf.mxu0 }
 0x1bc   :  { %1160 = vst.msk [vmem:[#allocation9 + $0x18] sm:$0xff] %vm1156_vm1, %v1442_v24 }
 0x1bd   :  { %v1007_v25 = vpop.f32.mrf.mxu0 }
 0x1be   :  { %1159 = vst.msk [vmem:[#allocation9 + $0x10] sm:$0xff] %vm1156_vm1, %v1007_v25 }
 0x1bf   :  { %v1445_v26 = vpop.f32.mrf.mxu0 }
 0x1c0   :  { %1162 = vst.msk [vmem:[#allocation9 + $0x28] sm:$0xff] %vm1156_vm1, %v1445_v26 }
 0x1c1   :  { %v1017_v27 = vpop.f32.mrf.mxu0 }
 0x1c2   :  { %1161 = vst.msk [vmem:[#allocation9 + $0x20] sm:$0xff] %vm1156_vm1, %v1017_v27 }
 0x1c3   :  { %v1448_v28 = vpop.f32.mrf.mxu0 }
 0x1c4   :  { %1164 = vst.msk [vmem:[#allocation9 + $0x38] sm:$0xff] %vm1156_vm1, %v1448_v28 }
 0x1c5   :  { %v1027_v29 = vpop.f32.mrf.mxu0 }
 0x1c6   :  { %1163 = vst.msk [vmem:[#allocation9 + $0x30] sm:$0xff] %vm1156_vm1, %v1027_v29 }
 0x1c7   :  { %v1451_v30 = vpop.f32.mrf.mxu0  ;;  %v1463_v31 = vpop.f32.mrf.mxu1 }
 0x1c8   :  { %1166 = vst.msk [vmem:[#allocation9 + $0x48] sm:$0xff] %vm1156_vm1, %v1451_v30  ;;  %1174 = vst.msk [vmem:[#allocation9 + $0x88] sm:$0xff] %vm1156_vm1, %v1463_v31 }
 0x1c9   :  { %v1037_v32 = vpop.f32.mrf.mxu0  ;;  %v1077_v33 = vpop.f32.mrf.mxu1 }
 0x1ca   :  { %1165 = vst.msk [vmem:[#allocation9 + $0x40] sm:$0xff] %vm1156_vm1, %v1037_v32  ;;  %1173 = vst.msk [vmem:[#allocation9 + $0x80] sm:$0xff] %vm1156_vm1, %v1077_v33 }
 0x1cb   :  { %v1454_v34 = vpop.f32.mrf.mxu0  ;;  %v1466_v35 = vpop.f32.mrf.mxu1 }
 0x1cc   :  { %1168 = vst.msk [vmem:[#allocation9 + $0x58] sm:$0xff] %vm1156_vm1, %v1454_v34  ;;  %1176 = vst.msk [vmem:[#allocation9 + $0x98] sm:$0xff] %vm1156_vm1, %v1466_v35 }
 0x1cd   :  { %v1047_v36 = vpop.f32.mrf.mxu0  ;;  %v1087_v37 = vpop.f32.mrf.mxu1 }
 0x1ce   :  { %1167 = vst.msk [vmem:[#allocation9 + $0x50] sm:$0xff] %vm1156_vm1, %v1047_v36  ;;  %1175 = vst.msk [vmem:[#allocation9 + $0x90] sm:$0xff] %vm1156_vm1, %v1087_v37 }
 0x1cf   :  { %v1457_v38 = vpop.f32.mrf.mxu0  ;;  %v1469_v39 = vpop.f32.mrf.mxu1 }
 0x1d0   :  { %1170 = vst.msk [vmem:[#allocation9 + $0x68] sm:$0xff] %vm1156_vm1, %v1457_v38  ;;  %1178 = vst.msk [vmem:[#allocation9 + $0xa8] sm:$0xff] %vm1156_vm1, %v1469_v39 }
 0x1d1   :  { %v1057_v40 = vpop.f32.mrf.mxu0  ;;  %v1097_v41 = vpop.f32.mrf.mxu1 }
 0x1d2   :  { %1169 = vst.msk [vmem:[#allocation9 + $0x60] sm:$0xff] %vm1156_vm1, %v1057_v40  ;;  %1177 = vst.msk [vmem:[#allocation9 + $0xa0] sm:$0xff] %vm1156_vm1, %v1097_v41 }
 0x1d3   :  { %v1460_v42 = vpop.f32.mrf.mxu0  ;;  %v1472_v43 = vpop.f32.mrf.mxu1 }
 0x1d4   :  { %1172 = vst.msk [vmem:[#allocation9 + $0x78] sm:$0xff] %vm1156_vm1, %v1460_v42  ;;  %1180 = vst.msk [vmem:[#allocation9 + $0xb8] sm:$0xff] %vm1156_vm1, %v1472_v43 }
 0x1d5   :  { %v1067_v44 = vpop.f32.mrf.mxu0  ;;  %v1107_v45 = vpop.f32.mrf.mxu1 }
 0x1d6   :  { %1171 = vst.msk [vmem:[#allocation9 + $0x70] sm:$0xff] %vm1156_vm1, %v1067_v44  ;;  %1179 = vst.msk [vmem:[#allocation9 + $0xb0] sm:$0xff] %vm1156_vm1, %v1107_v45 }
 0x1d7   :  { %v1475_v46 = vpop.f32.mrf.mxu1 }
 0x1d8   :  { %1182 = vst.msk [vmem:[#allocation9 + $0xc8] sm:$0xff] %vm1156_vm1, %v1475_v46 }
 0x1d9   :  { %v1117_v47 = vpop.f32.mrf.mxu1 }
 0x1da   :  { %1181 = vst.msk [vmem:[#allocation9 + $0xc0] sm:$0xff] %vm1156_vm1, %v1117_v47 }
 0x1db   :  { %v1478_v48 = vpop.f32.mrf.mxu1 }
 0x1dc   :  { %1184 = vst.msk [vmem:[#allocation9 + $0xd8] sm:$0xff] %vm1156_vm1, %v1478_v48 }
 0x1dd   :  { %v1127_v49 = vpop.f32.mrf.mxu1 }
 0x1de   :  { %1183 = vst.msk [vmem:[#allocation9 + $0xd0] sm:$0xff] %vm1156_vm1, %v1127_v49 }
 0x1df   :  { %v1481_v50 = vpop.f32.mrf.mxu1 }
 0x1e0   :  { %1186 = vst.msk [vmem:[#allocation9 + $0xe8] sm:$0xff] %vm1156_vm1, %v1481_v50 }
 0x1e1   :  { %v1137_v51 = vpop.f32.mrf.mxu1 }
 0x1e2   :  { %1185 = vst.msk [vmem:[#allocation9 + $0xe0] sm:$0xff] %vm1156_vm1, %v1137_v51 }
 0x1e3   :  { %v1484_v52 = vpop.f32.mrf.mxu1 }
 0x1e4   :  { %1188 = vst.msk [vmem:[#allocation9 + $0xf8] sm:$0xff] %vm1156_vm1, %v1484_v52 }
 0x1e5   :  { %v1147_v53 = vpop.f32.mrf.mxu1 }
 0x1e6   :  { %1187 = vst.msk [vmem:[#allocation9 + $0xf0] sm:$0xff] %vm1156_vm1, %v1147_v53 }
 0x1e7   :  { %1566 = shalt.err (!%p1563_p5)
}
 0x1e8   :  { %1200 = dma.vmem_to_hbm [thread:$0]  %s1195_s2, 4096, %s1792_s3, [#allocation5], %s1583_s17, %s1583_s17, %s1584_s18  }
 0x1e9   :  { %1579 = dma.done.wait [#allocation5], 4096  }
 0x1ea   :  { %1580 = vsyncadd [#allocation5], 4294963200 }
 0x1eb   :  { %1204 = vsyncpa [#allocation4], 1 }
 0x1ec   :  { %1205 = vsyncpa [#allocation7], 1 }
 0x1ed   :  { %1206 = vsyncpa [#allocation5], 1 }

</bundles_post_ra>
